<compile_context>
chip_gen: v7x
topology: tpu7x:2x2x1
jax: 0.10.0
libtpu: 0.0.40
codegen_flags: <defaults>
</compile_context>

<pallas_src>
import functools

import jax
import jax.numpy as jnp
from jax.experimental import pallas as pl
from jax.experimental.pallas import tpu as pltpu


def _round_up(n, m):
    return ((n + m - 1) // m) * m


def _hybrid_embed_kernel(x_ref, w_ref, b_ref, y_ref, g_ref, acc_ref, *,
                         inv_hw, mxu_bf16):
    # x_ref: (1, C, THW)   w_ref: (TE, C)   b_ref: (TE, 1) f32
    # y_ref: (1, TE, THW)  g_ref: (1, TE, 1) f32   acc_ref: (TE, 128) f32
    #
    # INVARIANT: the HW grid axis (axis 2) must stay innermost and
    # "arbitrary" — acc_ref carries the partial spatial sum across it.  The
    # B / E axes may be "parallel" (each core gets its own scratch copy).
    hw_i = pl.program_id(2)

    @pl.when(hw_i == 0)
    def _():
        acc_ref[...] = jnp.zeros_like(acc_ref)

    x = x_ref[0]                                       # (C, THW)
    w = w_ref[...]                                     # (TE, C)
    if mxu_bf16:
        # Cast MXU operands in-kernel (no extra HBM pass from a wrapper-side
        # bf16 copy of x); accumulation and bias add stay f32.
        x = x.astype(jnp.bfloat16)
        w = w.astype(jnp.bfloat16)
    # 1x1 conv == channel-contraction matmul on the MXU, f32 accumulate.
    z = jnp.dot(w, x, preferred_element_type=jnp.float32)       # (TE, THW) f32
    b = b_ref[...]                                               # (TE, 1) f32
    y_ref[0] = (z + b).astype(y_ref.dtype)

    # Lane-blocked partial spatial sum: 128-lane VPU slab adds into (TE, 128);
    # the single cross-lane (XLU) reduce is deferred to the finalize step.
    # Bias-free, so zero-padded spatial lanes contribute nothing.
    slab = z[:, 0:128]
    for j in range(1, z.shape[1] // 128):
        slab = slab + z[:, j * 128:(j + 1) * 128]
    acc_ref[...] += slab

    @pl.when(hw_i == pl.num_programs(2) - 1)
    def _():
        # mean(W x + b) == sum(W x)/HW + b  (padding-safe: divide by true HW).
        s = jnp.sum(acc_ref[...], axis=1, keepdims=True)         # (TE, 1)
        g_ref[0] = (s * inv_hw + b_ref[...]).astype(g_ref.dtype)


def hybrid_embed(x_nchw, w_proj, b_proj, *, thw=None, te=None, out_dtype=None,
                 mxu_bf16=False, vmem_budget_bytes=32 << 20):
    """HybridEmbed forward.

    Args:
      x_nchw: (B, C_feat, H, W) backbone feature map (backbone == identity).
      w_proj: (E, C_feat) — PyTorch Conv2d(1x1) weight (E, C, 1, 1) squeezed.
      b_proj: (E,) — 1x1 conv bias.
      thw:    optional explicit spatial tile (lane axis, multiple of 128);
              default is VMEM-budget-driven.
      te:     optional embed-dim tile (grid axis marked "parallel").
      out_dtype: dtype of y (default: x dtype).  g is always f32.
      mxu_bf16: cast both MXU operands to bf16 *inside* the kernel
              (f32 accumulate) — native MXU throughput on v6e/v7x.
      vmem_budget_bytes: VMEM budget driving the spatial tile choice.

    Returns:
      (y, global_x) with shapes (B, E, H, W) and (B, E, 1).
    """
    # TODO(synk): the backbone is an arbitrary nn.Module in the reference and
    # is treated as identity here (x_nchw is already the backbone feature map).
    B, C, H, W = x_nchw.shape
    E = w_proj.shape[0]
    HW = H * W
    out_dtype = out_dtype if out_dtype is not None else x_nchw.dtype

    # --- E tiling: only split when the batch alone cannot feed both v7x
    # TensorCores; the spatial mean is per output channel, so no cross-core
    # combine is needed.
    if te is None:
        if B >= 2 or E <= 256:
            te = E
        elif E % 256 == 0:
            te = 256
        elif E % 128 == 0:
            te = 128
        else:
            te = E
    assert E % te == 0, "te must divide embed_dim"
    n_e = E // te

    # Weight/bias prep (tiny one-time casts only; x is never copied in HBM).
    w = w_proj.astype(jnp.bfloat16) if mxu_bf16 else w_proj
    b2d = b_proj.astype(jnp.float32).reshape(E, 1)

    x_bytes = jnp.dtype(x_nchw.dtype).itemsize
    w_bytes = jnp.dtype(w.dtype).itemsize
    y_bytes = jnp.dtype(out_dtype).itemsize

    def vmem_need(t):
        return (2 * C * t * x_bytes            # x tile, double-buffered
                + 2 * te * t * y_bytes         # y tile, double-buffered
                + te * C * w_bytes             # weight (single-buffered)
                + te * 4                       # bias
                + te * 128 * 4                 # mean accumulator scratch
                + 2 * te * 4)                  # g tile

    # --- spatial tile: VMEM-budget-driven, multiple of 128, and a divisor of
    # the 128-rounded spatial extent so the grid covers it exactly.  Beyond
    # ~1-2K lanes the tiled mem-bound roofline is already ~86%, so cap there.
    hw128 = _round_up(HW, 128)
    if thw is None:
        t = min(2048, hw128)
        while t > 128 and (hw128 % t != 0 or vmem_need(t) > vmem_budget_bytes):
            t -= 128
        thw = t
    else:
        thw = _round_up(thw, 128)
    hw_pad = _round_up(HW, thw)

    # NCHW kept end-to-end: collapsing (H, W) -> HW is a free reshape.
    x_flat = x_nchw.reshape(B, C, HW)
    if hw_pad != HW:
        # Only when HW is not a multiple of 128 (or an explicit thw forces it).
        # Padded lanes are zeros, so the mean stays exact.
        x_flat = jnp.pad(x_flat, ((0, 0), (0, 0), (0, hw_pad - HW)))
    n_hw = hw_pad // thw

    # NOTE: C is the matmul K dim; for tiny backbone widths (e.g. the toy C=4)
    # the MXU is mostly idle and the kernel is overhead/HBM-bound by design.

    kernel = functools.partial(_hybrid_embed_kernel, inv_hw=1.0 / HW,
                               mxu_bf16=mxu_bf16)

    vmem_limit = int(min(max(1.5 * vmem_need(thw) + (4 << 20), 32 << 20),
                         60 << 20))

    def build_and_call(single_buffer_consts):
        if n_e == 1 and single_buffer_consts:
            # Constant index_map -> double-buffering these is pure VMEM waste.
            w_spec = pl.BlockSpec((te, C), lambda b, e, h: (0, 0),
                                  pipeline_mode=pl.Buffered(1))
            b_spec = pl.BlockSpec((te, 1), lambda b, e, h: (0, 0),
                                  pipeline_mode=pl.Buffered(1))
        else:
            w_spec = pl.BlockSpec((te, C), lambda b, e, h: (e, 0))
            b_spec = pl.BlockSpec((te, 1), lambda b, e, h: (e, 0))

        grid_spec = pltpu.PrefetchScalarGridSpec(
            num_scalar_prefetch=0,
            grid=(B, n_e, n_hw),
            in_specs=[
                pl.BlockSpec((1, C, thw), lambda b, e, h: (b, 0, h)),
                w_spec,
                b_spec,
            ],
            out_specs=[
                pl.BlockSpec((1, te, thw), lambda b, e, h: (b, e, h)),
                pl.BlockSpec((1, te, 1), lambda b, e, h: (b, e, 0)),
            ],
            scratch_shapes=[pltpu.VMEM((te, 128), jnp.float32)],
        )

        return pl.pallas_call(
            kernel,
            out_shape=(
                jax.ShapeDtypeStruct((B, E, hw_pad), out_dtype),
                jax.ShapeDtypeStruct((B, E, 1), jnp.float32),   # mean stays f32
            ),
            grid_spec=grid_spec,
            compiler_params=pltpu.CompilerParams(
                # HW axis MUST stay "arbitrary" (accumulator invariant above).
                dimension_semantics=("parallel", "parallel", "arbitrary"),
                vmem_limit_bytes=vmem_limit),
        )(x_flat, w, b2d)

    try:
        y_flat, g = build_and_call(single_buffer_consts=True)
    except Exception:
        # Fallback for builds without BlockSpec(pipeline_mode=...) support;
        # only costs one extra weight/bias buffer of VMEM.
        y_flat, g = build_and_call(single_buffer_consts=False)

    if hw_pad != HW:
        # TODO(synk): for non-128-multiple HW this slice is one extra HBM pass
        # over y; a masked last-tile store would remove it.
        y_flat = y_flat[:, :, :HW]
    y_nchw = y_flat.reshape(B, E, H, W)
    return y_nchw, g


if __name__ == "__main__":
    # Small shapes consistent with the module: backbone feature map
    # (B=2, feature_dim=4, H=W=16), embed_dim=32.
    B, C_FEAT, H, W = 2, 4, 16, 16
    EMBED_DIM = 32

    key = jax.random.PRNGKey(0)
    kx, kw, kb = jax.random.split(key, 3)

    x = jax.random.normal(kx, (B, C_FEAT, H, W), dtype=jnp.float32)
    # PyTorch Conv2d(1x1) weight shape (E, C, 1, 1) squeezed to (E, C).
    w = (jax.random.normal(kw, (EMBED_DIM, C_FEAT), dtype=jnp.float32)
         * (1.0 / jnp.sqrt(C_FEAT)))
    b = jax.random.normal(kb, (EMBED_DIM,), dtype=jnp.float32) * 0.01

    # Pure-JAX reference (1x1 conv == einsum over the channel dim).
    y_ref = jnp.einsum("bchw,ec->behw", x, w) + b[None, :, None, None]
    g_ref = jnp.mean(y_ref, axis=(2, 3))[:, :, None]

    # 1) Default path: budget-driven thw (HW=256 -> single spatial tile,
    #    no padding, no post-kernel slice copy).
    y, g = hybrid_embed(x, w, b)
    jax.block_until_ready((y, g))
    assert y.shape == (B, EMBED_DIM, H, W)
    assert g.shape == (B, EMBED_DIM, 1)
    assert jnp.allclose(y, y_ref, atol=1e-5, rtol=1e-5)
    assert jnp.allclose(g, g_ref, atol=1e-5, rtol=1e-5)

    # 2) thw=128 forces 2 spatial tiles -> exercises the cross-tile mean path.
    y2, g2 = hybrid_embed(x, w, b, thw=128)
    jax.block_until_ready((y2, g2))
    assert jnp.allclose(y2, y_ref, atol=1e-5, rtol=1e-5)
    assert jnp.allclose(g2, g_ref, atol=1e-5, rtol=1e-5)

    # 3) bf16 MXU operands (cast in-kernel) + bf16 y; mean g stays f32.
    y3, g3 = hybrid_embed(x, w, b, mxu_bf16=True, out_dtype=jnp.bfloat16)
    jax.block_until_ready((y3, g3))
    assert y3.dtype == jnp.bfloat16 and g3.dtype == jnp.float32
    assert jnp.allclose(y3.astype(jnp.float32), y_ref, atol=1e-1, rtol=1e-1)
    assert jnp.allclose(g3, g_ref, atol=1e-1, rtol=1e-1)

    # 4) Non-128-multiple HW (14x14=196) + explicit E tiling at B=1
    #    (inference-style v7x path: parallel E axis, padded spatial tile).
    x4 = jax.random.normal(kx, (1, C_FEAT, 14, 14), dtype=jnp.float32)
    y4_ref = jnp.einsum("bchw,ec->behw", x4, w) + b[None, :, None, None]
    g4_ref = jnp.mean(y4_ref, axis=(2, 3))[:, :, None]
    y4, g4 = hybrid_embed(x4, w, b, te=16)
    jax.block_until_ready((y4, g4))
    assert y4.shape == (1, EMBED_DIM, 14, 14)
    assert jnp.allclose(y4, y4_ref, atol=1e-5, rtol=1e-5)
    assert jnp.allclose(g4, g4_ref, atol=1e-5, rtol=1e-5)

    print("KERNEL_OK")
</pallas_src>

<mosaic_0001>
module attributes {stable_mosaic.version = 11 : i64} {
  func.func @_hybrid_embed_kernel(%arg0: i32, %arg1: i32, %arg2: i32, %arg3: memref<1x4x256xf32, #tpu.memory_space<vmem>>, %arg4: memref<32x4xf32, #tpu.memory_space<vmem>>, %arg5: memref<32x1xf32, #tpu.memory_space<vmem>>, %arg6: memref<1x32x256xf32, #tpu.memory_space<vmem>>, %arg7: memref<1x32x1xf32, #tpu.memory_space<vmem>>, %arg8: memref<32x128xf32, #tpu.memory_space<vmem>>) attributes {dimension_semantics = [#tpu.dimension_semantics<parallel>, #tpu.dimension_semantics<parallel>, #tpu.dimension_semantics<arbitrary>], iteration_bounds = array<i64: 2, 1, 1>, scalar_prefetch = 0 : i64, scratch_operands = 1 : i64, tpu.core_type = #tpu.core_type<tc>, window_params = [{transform_indices = @transform_0, window_bounds = array<i64: 1, 4, 256>}, {pipeline_mode = #tpu.pipeline_mode<synchronous>, transform_indices = @transform_1, window_bounds = array<i64: 32, 4>}, {pipeline_mode = #tpu.pipeline_mode<synchronous>, transform_indices = @transform_2, window_bounds = array<i64: 32, 1>}, {transform_indices = @transform_3, window_bounds = array<i64: 1, 32, 256>}, {transform_indices = @transform_4, window_bounds = array<i64: 1, 32, 1>}]} {
    %c0_i32 = arith.constant 0 : i32
    %0 = arith.cmpi eq, %arg2, %c0_i32 : i32
    %1 = arith.extui %0 : i1 to i32
    %c0_i32_0 = arith.constant 0 : i32
    %2 = arith.cmpi ne, %1, %c0_i32_0 : i32
    scf.if %2 {
      %cst_16 = arith.constant 0.000000e+00 : f32
      %22 = vector.broadcast %cst_16 : f32 to vector<32x128xf32>
      %c0_17 = arith.constant 0 : index
      %c0_18 = arith.constant 0 : index
      %23 = vector.load %arg8[%c0_17, %c0_18] : memref<32x128xf32, #tpu.memory_space<vmem>>, vector<32x128xf32>
      tpu.vector_store %arg8[%c0_17, %c0_18], %22 {strides = array<i32>} : memref<32x128xf32, #tpu.memory_space<vmem>>, vector<32x128xf32>,
    } else {
    }
    %c0 = arith.constant 0 : index
    %c0_1 = arith.constant 0 : index
    %c0_2 = arith.constant 0 : index
    %3 = vector.load %arg3[%c0, %c0_1, %c0_2] : memref<1x4x256xf32, #tpu.memory_space<vmem>>, vector<1x4x256xf32>
    %4 = vector.shape_cast %3 : vector<1x4x256xf32> to vector<4x256xf32>
    %c0_3 = arith.constant 0 : index
    %c0_4 = arith.constant 0 : index
    %5 = vector.load %arg4[%c0_3, %c0_4] : memref<32x4xf32, #tpu.memory_space<vmem>>, vector<32x4xf32>
    %cst = arith.constant dense<0.000000e+00> : vector<32x256xf32>
    %6 = tpu.matmul %5, %4, %cst {dimension_numbers = #tpu.dot_dimension_numbers<[1], [0], [0], [1], [0, 0, 1, 1], [], []>} : vector<32x4xf32>, vector<4x256xf32>, vector<32x256xf32> -> vector<32x256xf32>
    %c0_5 = arith.constant 0 : index
    %c0_6 = arith.constant 0 : index
    %7 = vector.load %arg5[%c0_5, %c0_6] : memref<32x1xf32, #tpu.memory_space<vmem>>, vector<32x1xf32>
    %8 = vector.broadcast %7 : vector<32x1xf32> to vector<32x256xf32>
    %9 = arith.addf %6, %8 : vector<32x256xf32>
    %c0_7 = arith.constant 0 : index
    %c0_8 = arith.constant 0 : index
    %c0_9 = arith.constant 0 : index
    %10 = vector.load %arg6[%c0_7, %c0_8, %c0_9] : memref<1x32x256xf32, #tpu.memory_space<vmem>>, vector<1x32x256xf32>
    %11 = vector.shape_cast %10 : vector<1x32x256xf32> to vector<32x256xf32>
    %12 = vector.shape_cast %9 : vector<32x256xf32> to vector<1x32x256xf32>
    tpu.vector_store %arg6[%c0_7, %c0_8, %c0_9], %12 {strides = array<i32>} : memref<1x32x256xf32, #tpu.memory_space<vmem>>, vector<1x32x256xf32>,
    %13 = vector.extract_strided_slice %6 {offsets = [0, 0], sizes = [32, 128], strides = [1, 1]} : vector<32x256xf32> to vector<32x128xf32>
    %14 = vector.extract_strided_slice %6 {offsets = [0, 128], sizes = [32, 128], strides = [1, 1]} : vector<32x256xf32> to vector<32x128xf32>
    %15 = arith.addf %13, %14 : vector<32x128xf32>
    %c0_10 = arith.constant 0 : index
    %c0_11 = arith.constant 0 : index
    %16 = vector.load %arg8[%c0_10, %c0_11] : memref<32x128xf32, #tpu.memory_space<vmem>>, vector<32x128xf32>
    %17 = arith.addf %16, %15 : vector<32x128xf32>
    %c0_12 = arith.constant 0 : index
    %c0_13 = arith.constant 0 : index
    %18 = vector.load %arg8[%c0_12, %c0_13] : memref<32x128xf32, #tpu.memory_space<vmem>>, vector<32x128xf32>
    tpu.vector_store %arg8[%c0_12, %c0_13], %17 {strides = array<i32>} : memref<32x128xf32, #tpu.memory_space<vmem>>, vector<32x128xf32>,
    %c0_i32_14 = arith.constant 0 : i32
    %19 = arith.cmpi eq, %arg2, %c0_i32_14 : i32
    %20 = arith.extui %19 : i1 to i32
    %c0_i32_15 = arith.constant 0 : i32
    %21 = arith.cmpi ne, %20, %c0_i32_15 : i32
    scf.if %21 {
      %c0_16 = arith.constant 0 : index
      %c0_17 = arith.constant 0 : index
      %22 = vector.load %arg8[%c0_16, %c0_17] : memref<32x128xf32, #tpu.memory_space<vmem>>, vector<32x128xf32>
      %cst_18 = arith.constant dense<0.000000e+00> : vector<32xf32>
      %23 = vector.multi_reduction <add>, %22, %cst_18 [1] : vector<32x128xf32> to vector<32xf32>
      %24 = vector.shape_cast %23 : vector<32xf32> to vector<32x1xf32>
      %cst_19 = arith.constant 3.906250e-03 : f32
      %25 = vector.broadcast %cst_19 : f32 to vector<32x1xf32>
      %26 = arith.mulf %24, %25 : vector<32x1xf32>
      %c0_20 = arith.constant 0 : index
      %c0_21 = arith.constant 0 : index
      %27 = vector.load %arg5[%c0_20, %c0_21] : memref<32x1xf32, #tpu.memory_space<vmem>>, vector<32x1xf32>
      %28 = arith.addf %26, %27 : vector<32x1xf32>
      %c0_22 = arith.constant 0 : index
      %c0_23 = arith.constant 0 : index
      %c0_24 = arith.constant 0 : index
      %29 = vector.load %arg7[%c0_22, %c0_23, %c0_24] : memref<1x32x1xf32, #tpu.memory_space<vmem>>, vector<1x32x1xf32>
      %30 = vector.shape_cast %29 : vector<1x32x1xf32> to vector<32x1xf32>
      %31 = vector.shape_cast %28 : vector<32x1xf32> to vector<1x32x1xf32>
      tpu.vector_store %arg7[%c0_22, %c0_23, %c0_24], %31 {strides = array<i32>} : memref<1x32x1xf32, #tpu.memory_space<vmem>>, vector<1x32x1xf32>,
    } else {
    }
    return
  }
  func.func @transform_0(%arg0: i32, %arg1: i32, %arg2: i32) -> (i32, i32, i32) {
    %c0_i32 = arith.constant 0 : i32
    %c0_i32_0 = arith.constant 0 : i32
    return %arg0, %c0_i32, %arg2 : i32, i32, i32
  }
  func.func @transform_1(%arg0: i32, %arg1: i32, %arg2: i32) -> (i32, i32) {
    %c0_i32 = arith.constant 0 : i32
    %c0_i32_0 = arith.constant 0 : i32
    %c0_i32_1 = arith.constant 0 : i32
    return %c0_i32, %c0_i32_0 : i32, i32
  }
  func.func @transform_2(%arg0: i32, %arg1: i32, %arg2: i32) -> (i32, i32) {
    %c0_i32 = arith.constant 0 : i32
    %c0_i32_0 = arith.constant 0 : i32
    %c0_i32_1 = arith.constant 0 : i32
    return %c0_i32, %c0_i32_0 : i32, i32
  }
  func.func @transform_3(%arg0: i32, %arg1: i32, %arg2: i32) -> (i32, i32, i32) {
    %c0_i32 = arith.constant 0 : i32
    return %arg0, %arg1, %arg2 : i32, i32, i32
  }
  func.func @transform_4(%arg0: i32, %arg1: i32, %arg2: i32) -> (i32, i32, i32) {
    %c0_i32 = arith.constant 0 : i32
    %c0_i32_0 = arith.constant 0 : i32
    return %arg0, %arg1, %c0_i32 : i32, i32, i32
  }
}

module attributes {stable_mosaic.version = 11 : i64} {
  func.func @_hybrid_embed_kernel(%arg0: i32, %arg1: i32, %arg2: i32, %arg3: memref<1x4x256xf32, #tpu.memory_space<vmem>>, %arg4: memref<32x4xf32, #tpu.memory_space<vmem>>, %arg5: memref<32x1xf32, #tpu.memory_space<vmem>>, %arg6: memref<1x32x256xf32, #tpu.memory_space<vmem>>, %arg7: memref<1x32x1xf32, #tpu.memory_space<vmem>>, %arg8: memref<32x128xf32, #tpu.memory_space<vmem>>) attributes {dimension_semantics = [#tpu.dimension_semantics<parallel>, #tpu.dimension_semantics<parallel>, #tpu.dimension_semantics<arbitrary>], iteration_bounds = array<i64: 2, 1, 1>, scalar_prefetch = 0 : i64, scratch_operands = 1 : i64, tpu.core_type = #tpu.core_type<tc>, window_params = [{transform_indices = @transform_0, window_bounds = array<i64: 1, 4, 256>}, {transform_indices = @transform_1, window_bounds = array<i64: 32, 4>}, {transform_indices = @transform_2, window_bounds = array<i64: 32, 1>}, {transform_indices = @transform_3, window_bounds = array<i64: 1, 32, 256>}, {transform_indices = @transform_4, window_bounds = array<i64: 1, 32, 1>}]} {
    %c0_i32 = arith.constant 0 : i32
    %0 = arith.cmpi eq, %arg2, %c0_i32 : i32
    %1 = arith.extui %0 : i1 to i32
    %c0_i32_0 = arith.constant 0 : i32
    %2 = arith.cmpi ne, %1, %c0_i32_0 : i32
    scf.if %2 {
      %cst_16 = arith.constant 0.000000e+00 : f32
      %22 = vector.broadcast %cst_16 : f32 to vector<32x128xf32>
      %c0_17 = arith.constant 0 : index
      %c0_18 = arith.constant 0 : index
      %23 = vector.load %arg8[%c0_17, %c0_18] : memref<32x128xf32, #tpu.memory_space<vmem>>, vector<32x128xf32>
      tpu.vector_store %arg8[%c0_17, %c0_18], %22 {strides = array<i32>} : memref<32x128xf32, #tpu.memory_space<vmem>>, vector<32x128xf32>,
    } else {
    }
    %c0 = arith.constant 0 : index
    %c0_1 = arith.constant 0 : index
    %c0_2 = arith.constant 0 : index
    %3 = vector.load %arg3[%c0, %c0_1, %c0_2] : memref<1x4x256xf32, #tpu.memory_space<vmem>>, vector<1x4x256xf32>
    %4 = vector.shape_cast %3 : vector<1x4x256xf32> to vector<4x256xf32>
    %c0_3 = arith.constant 0 : index
    %c0_4 = arith.constant 0 : index
    %5 = vector.load %arg4[%c0_3, %c0_4] : memref<32x4xf32, #tpu.memory_space<vmem>>, vector<32x4xf32>
    %cst = arith.constant dense<0.000000e+00> : vector<32x256xf32>
    %6 = tpu.matmul %5, %4, %cst {dimension_numbers = #tpu.dot_dimension_numbers<[1], [0], [0], [1], [0, 0, 1, 1], [], []>} : vector<32x4xf32>, vector<4x256xf32>, vector<32x256xf32> -> vector<32x256xf32>
    %c0_5 = arith.constant 0 : index
    %c0_6 = arith.constant 0 : index
    %7 = vector.load %arg5[%c0_5, %c0_6] : memref<32x1xf32, #tpu.memory_space<vmem>>, vector<32x1xf32>
    %8 = vector.broadcast %7 : vector<32x1xf32> to vector<32x256xf32>
    %9 = arith.addf %6, %8 : vector<32x256xf32>
    %c0_7 = arith.constant 0 : index
    %c0_8 = arith.constant 0 : index
    %c0_9 = arith.constant 0 : index
    %10 = vector.load %arg6[%c0_7, %c0_8, %c0_9] : memref<1x32x256xf32, #tpu.memory_space<vmem>>, vector<1x32x256xf32>
    %11 = vector.shape_cast %10 : vector<1x32x256xf32> to vector<32x256xf32>
    %12 = vector.shape_cast %9 : vector<32x256xf32> to vector<1x32x256xf32>
    tpu.vector_store %arg6[%c0_7, %c0_8, %c0_9], %12 {strides = array<i32>} : memref<1x32x256xf32, #tpu.memory_space<vmem>>, vector<1x32x256xf32>,
    %13 = vector.extract_strided_slice %6 {offsets = [0, 0], sizes = [32, 128], strides = [1, 1]} : vector<32x256xf32> to vector<32x128xf32>
    %14 = vector.extract_strided_slice %6 {offsets = [0, 128], sizes = [32, 128], strides = [1, 1]} : vector<32x256xf32> to vector<32x128xf32>
    %15 = arith.addf %13, %14 : vector<32x128xf32>
    %c0_10 = arith.constant 0 : index
    %c0_11 = arith.constant 0 : index
    %16 = vector.load %arg8[%c0_10, %c0_11] : memref<32x128xf32, #tpu.memory_space<vmem>>, vector<32x128xf32>
    %17 = arith.addf %16, %15 : vector<32x128xf32>
    %c0_12 = arith.constant 0 : index
    %c0_13 = arith.constant 0 : index
    %18 = vector.load %arg8[%c0_12, %c0_13] : memref<32x128xf32, #tpu.memory_space<vmem>>, vector<32x128xf32>
    tpu.vector_store %arg8[%c0_12, %c0_13], %17 {strides = array<i32>} : memref<32x128xf32, #tpu.memory_space<vmem>>, vector<32x128xf32>,
    %c0_i32_14 = arith.constant 0 : i32
    %19 = arith.cmpi eq, %arg2, %c0_i32_14 : i32
    %20 = arith.extui %19 : i1 to i32
    %c0_i32_15 = arith.constant 0 : i32
    %21 = arith.cmpi ne, %20, %c0_i32_15 : i32
    scf.if %21 {
      %c0_16 = arith.constant 0 : index
      %c0_17 = arith.constant 0 : index
      %22 = vector.load %arg8[%c0_16, %c0_17] : memref<32x128xf32, #tpu.memory_space<vmem>>, vector<32x128xf32>
      %cst_18 = arith.constant dense<0.000000e+00> : vector<32xf32>
      %23 = vector.multi_reduction <add>, %22, %cst_18 [1] : vector<32x128xf32> to vector<32xf32>
      %24 = vector.shape_cast %23 : vector<32xf32> to vector<32x1xf32>
      %cst_19 = arith.constant 3.906250e-03 : f32
      %25 = vector.broadcast %cst_19 : f32 to vector<32x1xf32>
      %26 = arith.mulf %24, %25 : vector<32x1xf32>
      %c0_20 = arith.constant 0 : index
      %c0_21 = arith.constant 0 : index
      %27 = vector.load %arg5[%c0_20, %c0_21] : memref<32x1xf32, #tpu.memory_space<vmem>>, vector<32x1xf32>
      %28 = arith.addf %26, %27 : vector<32x1xf32>
      %c0_22 = arith.constant 0 : index
      %c0_23 = arith.constant 0 : index
      %c0_24 = arith.constant 0 : index
      %29 = vector.load %arg7[%c0_22, %c0_23, %c0_24] : memref<1x32x1xf32, #tpu.memory_space<vmem>>, vector<1x32x1xf32>
      %30 = vector.shape_cast %29 : vector<1x32x1xf32> to vector<32x1xf32>
      %31 = vector.shape_cast %28 : vector<32x1xf32> to vector<1x32x1xf32>
      tpu.vector_store %arg7[%c0_22, %c0_23, %c0_24], %31 {strides = array<i32>} : memref<1x32x1xf32, #tpu.memory_space<vmem>>, vector<1x32x1xf32>,
    } else {
    }
    return
  }
  func.func @transform_0(%arg0: i32, %arg1: i32, %arg2: i32) -> (i32, i32, i32) {
    %c0_i32 = arith.constant 0 : i32
    %c0_i32_0 = arith.constant 0 : i32
    return %arg0, %c0_i32, %arg2 : i32, i32, i32
  }
  func.func @transform_1(%arg0: i32, %arg1: i32, %arg2: i32) -> (i32, i32) {
    %c0_i32 = arith.constant 0 : i32
    %c0_i32_0 = arith.constant 0 : i32
    return %arg1, %c0_i32 : i32, i32
  }
  func.func @transform_2(%arg0: i32, %arg1: i32, %arg2: i32) -> (i32, i32) {
    %c0_i32 = arith.constant 0 : i32
    %c0_i32_0 = arith.constant 0 : i32
    return %arg1, %c0_i32 : i32, i32
  }
  func.func @transform_3(%arg0: i32, %arg1: i32, %arg2: i32) -> (i32, i32, i32) {
    %c0_i32 = arith.constant 0 : i32
    return %arg0, %arg1, %arg2 : i32, i32, i32
  }
  func.func @transform_4(%arg0: i32, %arg1: i32, %arg2: i32) -> (i32, i32, i32) {
    %c0_i32 = arith.constant 0 : i32
    %c0_i32_0 = arith.constant 0 : i32
    return %arg0, %arg1, %c0_i32 : i32, i32, i32
  }
}

</mosaic_0001>

<bundles_post_ra>
// kernel: tpu_custom_call.1
= control target key start
LH: loop header
LB: loop body
LE: loop exit
PB: predicated region body
PF: predicated region fallthrough
CT: control target
= control target key end

     0   :  { %10 = vsyncpa [#allocation4], 0  ;;  %s982_s0 = inlined_call_operand.vmem [shape: f32[2,4,256], index: 0, kind: input, shape index: {}]   ;;  %s983_s1 = inlined_call_operand.vmem [shape: f32[32,4], index: 1, kind: input, shape index: {}]   ;;  %s984_s2 = inlined_call_operand.vmem [shape: f32[32,1], index: 2, kind: input, shape index: {}]   ;;  %s985_s3 = inlined_call_operand.hbm [shape: f32[2,32,256], index: 3, kind: output, shape index: {0}]   ;;  %s986_s4 = inlined_call_operand.vmem [shape: f32[2,32,1], index: 4, kind: output, shape index: {1}]  }
   0x1   :  { %12 = vsyncpa [#allocation4 + $0x1], 0  ;;  %s822_s15 = smov 0   ;;  %s824_s16 = smov 0  }
   0x2   :  { %s826_s17 = smov 0   ;;  %s828_s18 = smov 0  }
   0x3   :  { %s830_s19 = smov 0   ;;  %s832_s20 = smov 0  }
   0x4 LB: > { %s624_s21 = sadd.s32 4294967295, %s790_s20   ;;  %s625_s22 = sadd.s32 4294967294, %s790_s20   ;;  %s790_s20 = sphi %s832_s20, %s18_s20   ;;  %s786_s19 = sphi %s830_s19, %s993_s19   ;;  %s782_s18 = sphi %s828_s18, %s992_s18   ;;  %s778_s17 = sphi %s826_s17, %s991_s17   ;;  %s774_s16 = sphi %s824_s16, %s990_s16   ;;  %s770_s15 = sphi %s822_s15, %s989_s15  }
   0x5   : > { %s37_s23 = sadd.s32 1, %s786_s19  ;;  %s118_s24 = sadd.s32 1, %s778_s17 }
   0x6   : > { %p39_p0 = scmp.ge.s32.totalorder %s37_s23, 2  ;;  %p128_p1 = scmp.ne.s32.totalorder %s778_s17, %s774_s16 }
   0x7   : > { %p129_p2 = scmp.eq.s32.totalorder %s624_s21, 1  ;;  %p134_p3 = scmp.ne.s32.totalorder %s774_s16, %s770_s15 }
   0x8   : > { %s995_s23 = smov (%p39_p0, %s37_s23), 0  ;;  %p135_p5 = scmp.eq.s32.totalorder %s625_s22, 1 }
   0x9   : > { %p862_p4 = por %p129_p2, %p128_p1  ;;  %s111_s26 = ssub.s32 %s786_s19, %s995_s23 }
   0xa   : > { %p628_p6 = scmp.ge.s32.totalorder %s790_s20, 1  ;;  %p116_p7 = scmp.eq.s32.totalorder %s111_s26, 0 }
   0xb   : > { %p869_p8 = por %p135_p5, %p134_p3  ;;  %p200_p9 = scmp.lt.s32.totalorder %s790_s20, 3 }
   0xc   : > { %s875_s28 = scalar_select %p116_p7, %s778_s17, %s118_s24  }
   0xd   : > { %p201_p10 = pnand %p628_p6, %p200_p9 }
   0xe   : > { %p240_p11 = scmp.lt.s32.totalorder (!%p201_p10), %s782_s18, 1  ;;  %v792_v0 = vmov (!%p201_p10), 0.0   ;;  %vm289_vm0 = vcmask (!%p201_p10), 1043456   ;;  %v270_v3 = vld [vmem:[%s983_s1] sm:$0xff] (!%p201_p10)  ;;  %vm276_vm1 = vcmask (!%p201_p10), 31744   ;;  %v272_v4 = vld [vmem:[%s983_s1 + $0x10] sm:$0xff] (!%p201_p10) }
   0xf   : > { %204 = sbr.rel (%p201_p10) target bundleno = 466 (0x1d2), region = 32  ;;  %358 = vmatprep.mubr.f32.mxu0 (!%p201_p10), %v792_v0  ;;  %370 = vmatprep.mubr.f32.mxu1 (!%p201_p10), %v792_v0  ;;  %v271_v5 = vld [vmem:[%s983_s1 + $0x8] sm:$0xff] (!%p201_p10)  ;;  %v273_v6 = vld [vmem:[%s983_s1 + $0x18] sm:$0xff] (!%p201_p10)  ;;  %v793_v7 = vmov (!%p201_p10), 0   ;;  %v385_v21 = vld [vmem:[%s984_s2 + $0x10] sm:$0xff] (!%p201_p10)  ;;  %s225_s9 = sand.u32 (!%p201_p10), 1, %s774_s16  }
  0x10   : > { %710 = vset.pattern.permute.xlu1 (!%p201_p10), %v793_v7  ;;  %709 = vset.pattern.permute.xlu0 (!%p201_p10), %v793_v7  ;;  %v384_v20 = vld [vmem:[%s984_s2 + $0x8] sm:$0xff] (!%p201_p10)  ;;  %v383_v22 = vld [vmem:[%s984_s2] sm:$0xff] (!%p201_p10)  ;;  %v386_v23 = vld [vmem:[%s984_s2 + $0x18] sm:$0xff] (!%p201_p10)  ;;  %s629_s11 = sshll.u32 (!%p201_p10), %s225_s9, 6  ;;  %vm466_vm2 = vcmask (!%p201_p10), 7168   ;;  %s647_s21 = sshll.u32 (!%p201_p10), %s782_s18, 10 }
  0x11   : > { %s794_s6 = smov (!%p201_p10), [#allocation3]  }
  0x16   : > { %s879_s29 = scalar_select %p240_p11, %s782_s18, 1 }
  0x17   : > { %s936_s18 = scalar_lea.sflag [#allocation4], %s225_s9 }
  0x18   : > { %s645_s30 = sshll.u32 %s879_s29, 3  ;;  %s646_s10 = sshll.u32 %s879_s29, 5 }
  0x19   : > { %s247_s7 = scalar_lea.vmem %s982_s0, %s645_s30  ;;  %s916_s14 = scalar_lea.vmem %s986_s4, %s646_s10 }
  0x1a   : > { %v269_v1 = vld [vmem:[%s247_s7] sm:$0xff]  ;;  %s227_s29 = scalar_lea.vmem [#allocation3], %s629_s11  ;;  %s928_s30 = scalar_lea.hbm %s985_s3, %s647_s21 }
  0x1b   : > { %v275_v2 = vcombine.high %v269_v1, %v269_v1  ;;  %s499_s22 = sshll.u32 %s227_s29, 4  ;;  %s716_s7 = sshll.u32 %s794_s6, 4  ;;  %s930_s22 = int_to_ptr.vmem [resolvable:$true] %s499_s22  ;;  %s717_s7 = int_to_ptr.vmem [resolvable:$false] %s716_s7 }
  0x1c   : > { %s712_s5 = scalar_lea.vmem %s930_s22, 1024  ;;  %s718_s8 = scalar_lea.vmem %s717_s7, 2048 }
  0x1d   : > { %634 = vmatprep.subr.msk.mxu0 %vm289_vm0, %v275_v2  ;;  %648 = vmatprep.subr.msk.mxu1 %vm289_vm0, %v275_v2  ;;  %p713_p12 = scmp.ne.s32.totalorder %s930_s22, %s712_s5  ;;  %p719_p1 = scmp.lt.s32.totalorder %s930_s22, %s717_s7 }
  0x1e   : > { %635 = vmatpush1.msk.msra.mxu0 %vm289_vm0, %v269_v1  ;;  %649 = vmatpush1.msk.msra.mxu1 %vm289_vm0, %v269_v1  ;;  %p720_p2 = scmp.lt.s32.totalorder %s718_s8, %s712_s5 }
  0x1f   : > { %636 = vmatmul.mubr.msk.f32.vlgmr.msra.gmra.mrb[0].mxu0 %vm276_vm1, %v270_v3  ;;  %638 = vmatmul.mubr.msk.f32.vlgmr.msra.gmra.mrb[0].mxu1 %vm276_vm1, %v272_v4  ;;  %p714_p13 = pnand %p713_p12, %p862_p4 }
  0x20   : > { %364 = vmatprep.mubr.f32.mxu0 %v792_v0  ;;  %376 = vmatprep.mubr.f32.mxu1 %v792_v0  ;;  %p721_p3 = por %p720_p2, %p719_p1 }
  0x21   : > { %p715_p0 = pneg %p714_p13 }
  0x23   : > { %637 = vmatmul.mubr.msk.f32.gmra.mrb[2].mxu0 %vm276_vm1, %v271_v5  ;;  %639 = vmatmul.mubr.msk.f32.gmra.mrb[2].mxu1 %vm276_vm1, %v273_v6  ;;  %p722_p5 = pnand %p721_p3, %p715_p0 }
  0xf2   : > { %v360_v8 = vpop.f32.mrb[0].mxu0  ;;  %v372_v9 = vpop.f32.mrb[0].mxu1 }
  0xf3   : > { %v362_v10 = vpop.f32.mrb[1].mxu0  ;;  %v374_v11 = vpop.f32.mrb[1].mxu1 }
  0xf4   : > { %v425_v12 = vadd.f32 %v374_v11, %v372_v9  ;;  %v423_v13 = vadd.f32 %v362_v10, %v360_v8 }
  0xf6   : > { %450 = vadd.xlane.f32.xlu1 %v425_v12  ;;  %446 = vadd.xlane.f32.xlu0 %v423_v13  ;;  %v366_v14 = vpop.f32.mrb[2].mxu0  ;;  %v378_v15 = vpop.f32.mrb[2].mxu1 }
  0xf7   : > { %v368_v16 = vpop.f32.mrb[3].mxu0  ;;  %v380_v17 = vpop.f32.mrb[3].mxu1 }
  0xf8   : > { %v424_v18 = vadd.f32 %v368_v16, %v366_v14  ;;  %v426_v19 = vadd.f32 %v380_v17, %v378_v15 }
  0xfa   : > { %448 = vadd.xlane.f32.xlu0 %v424_v18 }
 0x107   : > { %394 = vperm.xlu1 %710, %v384_v20  }
 0x10b   : > { %399 = vperm.xlu1 %710, %v385_v21  }
 0x110   : > { %389 = vperm.xlu0 %709, %v383_v22  }
 0x12f   : > { %452 = vadd.xlane.f32.xlu1 %v426_v19 }
 0x140   : > { %404 = vperm.xlu1 %710, %v386_v23  }
 0x183   : > { %v451_v24 = vpop.xlane.xlu1 %450  ;;  %v447_v25 = vpop.xlane.xlu0 %446 }
 0x184   : > { %v456_v26 = vmul.f32 0.00390625, %v451_v24  ;;  %v454_v27 = vmul.f32 0.00390625, %v447_v25 }
 0x186   : > { %v464_v28 = vadd.f32 %v456_v26, %v385_v21  ;;  %v462_v29 = vadd.f32 %v454_v27, %v383_v22 }
 0x187   : > { %v395_v30 = vpop.permute.xlu1 %394  ;;  %v449_v31 = vpop.xlane.xlu0 %448 }
 0x188   : > { %469 = vst.msk [vmem:[%s916_s14 + $0x10] sm:$0xff] %vm466_vm2, %v464_v28  ;;  %v409_v32 = vadd.f32 %v395_v30, %v366_v14  ;;  %v410_v33 = vadd.f32 %v395_v30, %v368_v16  ;;  %467 = vst.msk [vmem:[%s916_s14] sm:$0xff] %vm466_vm2, %v462_v29  ;;  %v455_v34 = vmul.f32 0.00390625, %v449_v31 }
 0x18a   : > { %417 = vst [vmem:[%s227_s29 + $0x10] sm:$0xff] %v409_v32  ;;  %418 = vst [vmem:[%s227_s29 + $0x18] sm:$0xff] %v410_v33  ;;  %v463_v35 = vadd.f32 %v455_v34, %v384_v20 }
 0x18b   : > { %v400_v36 = vpop.permute.xlu1 %399 }
 0x18c   : > { %v411_v37 = vadd.f32 %v400_v36, %v372_v9  ;;  %v412_v38 = vadd.f32 %v400_v36, %v374_v11  ;;  %468 = vst.msk [vmem:[%s916_s14 + $0x8] sm:$0xff] %vm466_vm2, %v463_v35 }
 0x18e   : > { %419 = vst [vmem:[%s227_s29 + $0x20] sm:$0xff] %v411_v37  ;;  %420 = vst [vmem:[%s227_s29 + $0x28] sm:$0xff] %v412_v38 }
 0x18f   : > { %v390_v39 = vpop.permute.xlu0 %389 }
 0x190   : > { %v407_v40 = vadd.f32 %v390_v39, %v360_v8  ;;  %v408_v41 = vadd.f32 %v390_v39, %v362_v10 }
 0x192   : > { %415 = vst [vmem:[%s227_s29] sm:$0xff] %v407_v40  ;;  %416 = vst [vmem:[%s227_s29 + $0x8] sm:$0xff] %v408_v41 }
 0x1bc   : > { %v453_v42 = vpop.xlane.xlu1 %452 }
 0x1bd   : > { %v457_v43 = vmul.f32 0.00390625, %v453_v42 }
 0x1bf   : > { %v465_v44 = vadd.f32 %v457_v43, %v386_v23 }
 0x1c0   : > { %v405_v45 = vpop.permute.xlu1 %404 }
 0x1c1   : > { %470 = vst.msk [vmem:[%s916_s14 + $0x18] sm:$0xff] %vm466_vm2, %v465_v44  ;;  %v413_v46 = vadd.f32 %v405_v45, %v378_v15  ;;  %v414_v47 = vadd.f32 %v405_v45, %v380_v17 }
 0x1c3   : > { %421 = vst [vmem:[%s227_s29 + $0x30] sm:$0xff] %v413_v46  ;;  %422 = vst [vmem:[%s227_s29 + $0x38] sm:$0xff] %v414_v47 }
 0x1c4   : > { %725 = shalt.err (!%p722_p5)
}
 0x1c5   : > { %s726_s9 = scalar_lea.hbm %s928_s30, 1024  ;;  %s730_s12 = scalar_lea.hbm %s985_s3, 2048 }
 0x1c6   : > { %p727_p6 = scmp.ne.s32.totalorder %s928_s30, %s726_s9  ;;  %p731_p10 = scmp.lt.u32.totalorder %s928_s30, %s985_s3 }
 0x1c7   : > { %p732_p11 = scmp.lt.u32.totalorder %s730_s12, %s726_s9  ;;  %p734_p13 = scmp.lt.u32.totalorder %s726_s9, %s928_s30 }
 0x1c8   : > { %p728_p7 = pnand %p727_p6, %p862_p4 }
 0x1c9   : > { %p733_p12 = por %p732_p11, %p731_p10 }
 0x1ca   : > { %p729_p9 = pneg %p728_p7 }
 0x1cb   : > { %p735_p0 = por %p734_p13, %p733_p12 }
 0x1cd   : > { %p736_p1 = pnand %p735_p0, %p729_p9 }
 0x1cf   : > { %739 = shalt.err (!%p736_p1)
}
 0x1d0   : > { %s795_s29 = smov 256   ;;  %s796_s21 = smov 16  }
 0x1d1   : > { %650 = dma.vmem_to_hbm [thread:$0]  (%p862_p4), %s930_s22, 1024, %s928_s30, %s936_s18, %s795_s29, %s795_s29, %s796_s21  }
 0x1d2 PF: > { %p656_p2 = scmp.ge.s32.totalorder %s790_s20, 2  ;;  %s518_s24 = sand.u32 1, %s770_s15  }
 0x1d3   : > { %s519_s26 = scalar_lea.sflag [#allocation4], %s518_s24 }
 0x1d4   : > { %p653_p3 = pnand %p656_p2, %p869_p8 }
 0x1d6   : > { %765 = dma.done.wait (!%p653_p3), %s519_s26, 1024  }
 0x1d7   : > { %767 = vsyncadd (!%p653_p3), %s519_s26, 4294966272  ;;  %s18_s20 = sadd.s32 1, %s790_s20   ;;  %s989_s15 = smov %s774_s16 }
 0x1d8   : > { %p15_p5 = scmp.ge.s32.totalorder %s18_s20, 4   ;;  %s990_s16 = smov %s778_s17 }
 0x1d9   : > { %s991_s17 = smov %s875_s28  ;;  %s992_s18 = smov %s786_s19 }
 0x1da   : > { %s993_s19 = smov %s995_s23  ;;  %17 = sbr.rel (!%p15_p5) target bundleno = 4 (0x4), region = 87 }
 0x1e1   :  { %536 = vsyncpa [#allocation4], 1 }
 0x1e2   :  { %538 = vsyncpa [#allocation4 + $0x1], 1 }

// kernel: tpu_custom_call.1
= control target key start
LH: loop header
LB: loop body
LE: loop exit
PB: predicated region body
PF: predicated region fallthrough
CT: control target
= control target key end

     0   :  { %10 = vsyncpa [#allocation4], 0  ;;  %s1058_s0 = inlined_call_operand.vmem [shape: f32[2,4,256], index: 0, kind: input, shape index: {}]   ;;  %s1059_s1 = inlined_call_operand.vmem [shape: f32[32,4], index: 1, kind: input, shape index: {}]   ;;  %s1060_s2 = inlined_call_operand.vmem [shape: f32[32,1], index: 2, kind: input, shape index: {}]   ;;  %s1061_s3 = inlined_call_operand.hbm [shape: f32[2,32,256], index: 3, kind: output, shape index: {0}]   ;;  %s1062_s4 = inlined_call_operand.vmem [shape: f32[2,32,1], index: 4, kind: output, shape index: {1}]  }
   0x1   :  { %12 = vsyncpa [#allocation4 + $0x1], 0  ;;  %s898_s15 = smov 0   ;;  %s900_s16 = smov 0  }
   0x2   :  { %s902_s17 = smov 0   ;;  %s904_s18 = smov 0  }
   0x3   :  { %s906_s19 = smov 0   ;;  %s908_s20 = smov 0  }
   0x4 LB: > { %s698_s21 = sadd.s32 4294967295, %s866_s20   ;;  %s699_s22 = sadd.s32 4294967294, %s866_s20   ;;  %s866_s20 = sphi %s908_s20, %s18_s20   ;;  %s862_s19 = sphi %s906_s19, %s1069_s19   ;;  %s858_s18 = sphi %s904_s18, %s1068_s18   ;;  %s854_s17 = sphi %s902_s17, %s1067_s17   ;;  %s850_s16 = sphi %s900_s16, %s1066_s16   ;;  %s846_s15 = sphi %s898_s15, %s1065_s15  }
   0x5   : > { %s37_s23 = sadd.s32 1, %s862_s19  ;;  %s128_s24 = sadd.s32 1, %s854_s17 }
   0x6   : > { %p39_p0 = scmp.ge.s32.totalorder %s37_s23, 2  ;;  %p138_p1 = scmp.ne.s32.totalorder %s854_s17, %s850_s16 }
   0x7   : > { %p139_p2 = scmp.eq.s32.totalorder %s698_s21, 1  ;;  %p144_p3 = scmp.ne.s32.totalorder %s850_s16, %s846_s15 }
   0x8   : > { %s1071_s23 = smov (%p39_p0, %s37_s23), 0  ;;  %p145_p5 = scmp.eq.s32.totalorder %s699_s22, 1 }
   0x9   : > { %p938_p4 = por %p139_p2, %p138_p1  ;;  %s121_s26 = ssub.s32 %s862_s19, %s1071_s23 }
   0xa   : > { %p704_p6 = scmp.ge.s32.totalorder %s866_s20, 1  ;;  %p126_p7 = scmp.eq.s32.totalorder %s121_s26, 0 }
   0xb   : > { %p945_p8 = por %p145_p5, %p144_p3  ;;  %p222_p9 = scmp.lt.s32.totalorder %s866_s20, 3 }
   0xc   : > { %s951_s28 = scalar_select %p126_p7, %s854_s17, %s128_s24  }
   0xd   : > { %p223_p10 = pnand %p704_p6, %p222_p9 }
   0xe   : > { %p272_p11 = scmp.lt.s32.totalorder (!%p223_p10), %s858_s18, 1  ;;  %v868_v0 = vmov (!%p223_p10), 0.0   ;;  %vm333_vm0 = vcmask (!%p223_p10), 1043456   ;;  %v314_v3 = vld [vmem:[%s1059_s1] sm:$0xff] (!%p223_p10)  ;;  %vm320_vm1 = vcmask (!%p223_p10), 31744   ;;  %v316_v4 = vld [vmem:[%s1059_s1 + $0x10] sm:$0xff] (!%p223_p10) }
   0xf   : > { %226 = sbr.rel (%p223_p10) target bundleno = 466 (0x1d2), region = 32  ;;  %402 = vmatprep.mubr.f32.mxu0 (!%p223_p10), %v868_v0  ;;  %414 = vmatprep.mubr.f32.mxu1 (!%p223_p10), %v868_v0  ;;  %v315_v5 = vld [vmem:[%s1059_s1 + $0x8] sm:$0xff] (!%p223_p10)  ;;  %v317_v6 = vld [vmem:[%s1059_s1 + $0x18] sm:$0xff] (!%p223_p10)  ;;  %v869_v7 = vmov (!%p223_p10), 0   ;;  %v429_v21 = vld [vmem:[%s1060_s2 + $0x10] sm:$0xff] (!%p223_p10)  ;;  %s257_s9 = sand.u32 (!%p223_p10), 1, %s850_s16  }
  0x10   : > { %786 = vset.pattern.permute.xlu1 (!%p223_p10), %v869_v7  ;;  %785 = vset.pattern.permute.xlu0 (!%p223_p10), %v869_v7  ;;  %v428_v20 = vld [vmem:[%s1060_s2 + $0x8] sm:$0xff] (!%p223_p10)  ;;  %v427_v22 = vld [vmem:[%s1060_s2] sm:$0xff] (!%p223_p10)  ;;  %v430_v23 = vld [vmem:[%s1060_s2 + $0x18] sm:$0xff] (!%p223_p10)  ;;  %s705_s11 = sshll.u32 (!%p223_p10), %s257_s9, 6  ;;  %vm510_vm2 = vcmask (!%p223_p10), 7168   ;;  %s723_s21 = sshll.u32 (!%p223_p10), %s858_s18, 10 }
  0x11   : > { %s870_s6 = smov (!%p223_p10), [#allocation3]  }
  0x16   : > { %s955_s29 = scalar_select %p272_p11, %s858_s18, 1 }
  0x17   : > { %s1012_s18 = scalar_lea.sflag [#allocation4], %s257_s9 }
  0x18   : > { %s721_s30 = sshll.u32 %s955_s29, 3  ;;  %s722_s10 = sshll.u32 %s955_s29, 5 }
  0x19   : > { %s279_s7 = scalar_lea.vmem %s1058_s0, %s721_s30  ;;  %s992_s14 = scalar_lea.vmem %s1062_s4, %s722_s10 }
  0x1a   : > { %v313_v1 = vld [vmem:[%s279_s7] sm:$0xff]  ;;  %s259_s29 = scalar_lea.vmem [#allocation3], %s705_s11  ;;  %s1004_s30 = scalar_lea.hbm %s1061_s3, %s723_s21 }
  0x1b   : > { %v319_v2 = vcombine.high %v313_v1, %v313_v1  ;;  %s543_s22 = sshll.u32 %s259_s29, 4  ;;  %s792_s7 = sshll.u32 %s870_s6, 4  ;;  %s1006_s22 = int_to_ptr.vmem [resolvable:$true] %s543_s22  ;;  %s793_s7 = int_to_ptr.vmem [resolvable:$false] %s792_s7 }
  0x1c   : > { %s788_s5 = scalar_lea.vmem %s1006_s22, 1024  ;;  %s794_s8 = scalar_lea.vmem %s793_s7, 2048 }
  0x1d   : > { %710 = vmatprep.subr.msk.mxu0 %vm333_vm0, %v319_v2  ;;  %724 = vmatprep.subr.msk.mxu1 %vm333_vm0, %v319_v2  ;;  %p789_p12 = scmp.ne.s32.totalorder %s1006_s22, %s788_s5  ;;  %p795_p1 = scmp.lt.s32.totalorder %s1006_s22, %s793_s7 }
  0x1e   : > { %711 = vmatpush1.msk.msra.mxu0 %vm333_vm0, %v313_v1  ;;  %725 = vmatpush1.msk.msra.mxu1 %vm333_vm0, %v313_v1  ;;  %p796_p2 = scmp.lt.s32.totalorder %s794_s8, %s788_s5 }
  0x1f   : > { %712 = vmatmul.mubr.msk.f32.vlgmr.msra.gmra.mrb[0].mxu0 %vm320_vm1, %v314_v3  ;;  %714 = vmatmul.mubr.msk.f32.vlgmr.msra.gmra.mrb[0].mxu1 %vm320_vm1, %v316_v4  ;;  %p790_p13 = pnand %p789_p12, %p938_p4 }
  0x20   : > { %408 = vmatprep.mubr.f32.mxu0 %v868_v0  ;;  %420 = vmatprep.mubr.f32.mxu1 %v868_v0  ;;  %p797_p3 = por %p796_p2, %p795_p1 }
  0x21   : > { %p791_p0 = pneg %p790_p13 }
  0x23   : > { %713 = vmatmul.mubr.msk.f32.gmra.mrb[2].mxu0 %vm320_vm1, %v315_v5  ;;  %715 = vmatmul.mubr.msk.f32.gmra.mrb[2].mxu1 %vm320_vm1, %v317_v6  ;;  %p798_p5 = pnand %p797_p3, %p791_p0 }
  0xf2   : > { %v404_v8 = vpop.f32.mrb[0].mxu0  ;;  %v416_v9 = vpop.f32.mrb[0].mxu1 }
  0xf3   : > { %v406_v10 = vpop.f32.mrb[1].mxu0  ;;  %v418_v11 = vpop.f32.mrb[1].mxu1 }
  0xf4   : > { %v469_v12 = vadd.f32 %v418_v11, %v416_v9  ;;  %v467_v13 = vadd.f32 %v406_v10, %v404_v8 }
  0xf6   : > { %494 = vadd.xlane.f32.xlu1 %v469_v12  ;;  %490 = vadd.xlane.f32.xlu0 %v467_v13  ;;  %v410_v14 = vpop.f32.mrb[2].mxu0  ;;  %v422_v15 = vpop.f32.mrb[2].mxu1 }
  0xf7   : > { %v412_v16 = vpop.f32.mrb[3].mxu0  ;;  %v424_v17 = vpop.f32.mrb[3].mxu1 }
  0xf8   : > { %v468_v18 = vadd.f32 %v412_v16, %v410_v14  ;;  %v470_v19 = vadd.f32 %v424_v17, %v422_v15 }
  0xfa   : > { %492 = vadd.xlane.f32.xlu0 %v468_v18 }
 0x107   : > { %438 = vperm.xlu1 %786, %v428_v20  }
 0x10b   : > { %443 = vperm.xlu1 %786, %v429_v21  }
 0x110   : > { %433 = vperm.xlu0 %785, %v427_v22  }
 0x12f   : > { %496 = vadd.xlane.f32.xlu1 %v470_v19 }
 0x140   : > { %448 = vperm.xlu1 %786, %v430_v23  }
 0x183   : > { %v495_v24 = vpop.xlane.xlu1 %494  ;;  %v491_v25 = vpop.xlane.xlu0 %490 }
 0x184   : > { %v500_v26 = vmul.f32 0.00390625, %v495_v24  ;;  %v498_v27 = vmul.f32 0.00390625, %v491_v25 }
 0x186   : > { %v508_v28 = vadd.f32 %v500_v26, %v429_v21  ;;  %v506_v29 = vadd.f32 %v498_v27, %v427_v22 }
 0x187   : > { %v439_v30 = vpop.permute.xlu1 %438  ;;  %v493_v31 = vpop.xlane.xlu0 %492 }
 0x188   : > { %513 = vst.msk [vmem:[%s992_s14 + $0x10] sm:$0xff] %vm510_vm2, %v508_v28  ;;  %v453_v32 = vadd.f32 %v439_v30, %v410_v14  ;;  %v454_v33 = vadd.f32 %v439_v30, %v412_v16  ;;  %511 = vst.msk [vmem:[%s992_s14] sm:$0xff] %vm510_vm2, %v506_v29  ;;  %v499_v34 = vmul.f32 0.00390625, %v493_v31 }
 0x18a   : > { %461 = vst [vmem:[%s259_s29 + $0x10] sm:$0xff] %v453_v32  ;;  %462 = vst [vmem:[%s259_s29 + $0x18] sm:$0xff] %v454_v33  ;;  %v507_v35 = vadd.f32 %v499_v34, %v428_v20 }
 0x18b   : > { %v444_v36 = vpop.permute.xlu1 %443 }
 0x18c   : > { %v455_v37 = vadd.f32 %v444_v36, %v416_v9  ;;  %v456_v38 = vadd.f32 %v444_v36, %v418_v11  ;;  %512 = vst.msk [vmem:[%s992_s14 + $0x8] sm:$0xff] %vm510_vm2, %v507_v35 }
 0x18e   : > { %463 = vst [vmem:[%s259_s29 + $0x20] sm:$0xff] %v455_v37  ;;  %464 = vst [vmem:[%s259_s29 + $0x28] sm:$0xff] %v456_v38 }
 0x18f   : > { %v434_v39 = vpop.permute.xlu0 %433 }
 0x190   : > { %v451_v40 = vadd.f32 %v434_v39, %v404_v8  ;;  %v452_v41 = vadd.f32 %v434_v39, %v406_v10 }
 0x192   : > { %459 = vst [vmem:[%s259_s29] sm:$0xff] %v451_v40  ;;  %460 = vst [vmem:[%s259_s29 + $0x8] sm:$0xff] %v452_v41 }
 0x1bc   : > { %v497_v42 = vpop.xlane.xlu1 %496 }
 0x1bd   : > { %v501_v43 = vmul.f32 0.00390625, %v497_v42 }
 0x1bf   : > { %v509_v44 = vadd.f32 %v501_v43, %v430_v23 }
 0x1c0   : > { %v449_v45 = vpop.permute.xlu1 %448 }
 0x1c1   : > { %514 = vst.msk [vmem:[%s992_s14 + $0x18] sm:$0xff] %vm510_vm2, %v509_v44  ;;  %v457_v46 = vadd.f32 %v449_v45, %v422_v15  ;;  %v458_v47 = vadd.f32 %v449_v45, %v424_v17 }
 0x1c3   : > { %465 = vst [vmem:[%s259_s29 + $0x30] sm:$0xff] %v457_v46  ;;  %466 = vst [vmem:[%s259_s29 + $0x38] sm:$0xff] %v458_v47 }
 0x1c4   : > { %801 = shalt.err (!%p798_p5)
}
 0x1c5   : > { %s802_s9 = scalar_lea.hbm %s1004_s30, 1024  ;;  %s806_s12 = scalar_lea.hbm %s1061_s3, 2048 }
 0x1c6   : > { %p803_p6 = scmp.ne.s32.totalorder %s1004_s30, %s802_s9  ;;  %p807_p10 = scmp.lt.u32.totalorder %s1004_s30, %s1061_s3 }
 0x1c7   : > { %p808_p11 = scmp.lt.u32.totalorder %s806_s12, %s802_s9  ;;  %p810_p13 = scmp.lt.u32.totalorder %s802_s9, %s1004_s30 }
 0x1c8   : > { %p804_p7 = pnand %p803_p6, %p938_p4 }
 0x1c9   : > { %p809_p12 = por %p808_p11, %p807_p10 }
 0x1ca   : > { %p805_p9 = pneg %p804_p7 }
 0x1cb   : > { %p811_p0 = por %p810_p13, %p809_p12 }
 0x1cd   : > { %p812_p1 = pnand %p811_p0, %p805_p9 }
 0x1cf   : > { %815 = shalt.err (!%p812_p1)
}
 0x1d0   : > { %s871_s29 = smov 256   ;;  %s872_s21 = smov 16  }
 0x1d1   : > { %726 = dma.vmem_to_hbm [thread:$0]  (%p938_p4), %s1006_s22, 1024, %s1004_s30, %s1012_s18, %s871_s29, %s871_s29, %s872_s21  }
 0x1d2 PF: > { %p732_p2 = scmp.ge.s32.totalorder %s866_s20, 2  ;;  %s562_s24 = sand.u32 1, %s846_s15  }
 0x1d3   : > { %s563_s26 = scalar_lea.sflag [#allocation4], %s562_s24 }
 0x1d4   : > { %p729_p3 = pnand %p732_p2, %p945_p8 }
 0x1d6   : > { %841 = dma.done.wait (!%p729_p3), %s563_s26, 1024  }
 0x1d7   : > { %843 = vsyncadd (!%p729_p3), %s563_s26, 4294966272  ;;  %s18_s20 = sadd.s32 1, %s866_s20   ;;  %s1065_s15 = smov %s850_s16 }
 0x1d8   : > { %p15_p5 = scmp.ge.s32.totalorder %s18_s20, 4   ;;  %s1066_s16 = smov %s854_s17 }
 0x1d9   : > { %s1067_s17 = smov %s951_s28  ;;  %s1068_s18 = smov %s862_s19 }
 0x1da   : > { %s1069_s19 = smov %s1071_s23  ;;  %17 = sbr.rel (!%p15_p5) target bundleno = 4 (0x4), region = 93 }
 0x1e1   :  { %580 = vsyncpa [#allocation4], 1 }
 0x1e2   :  { %582 = vsyncpa [#allocation4 + $0x1], 1 }

</bundles_post_ra>
